<compile_context>
chip_gen: v6e
topology: v6e:2x2x1
jax: 0.10.0
libtpu: 0.0.40
codegen_flags: <defaults>
</compile_context>

<pallas_src>
import functools
import math

import jax
import jax.numpy as jnp
from jax.experimental import pallas as pl
from jax.experimental.pallas import tpu as pltpu


def _layernorm(x, gamma, beta, eps=1e-5):
    # PyTorch nn.LayerNorm: biased variance over last dim, eps inside sqrt.
    mean = jnp.mean(x, axis=-1, keepdims=True)
    var = jnp.mean((x - mean) ** 2, axis=-1, keepdims=True)
    return (x - mean) * jax.lax.rsqrt(var + eps) * gamma + beta


def _gelu_exact(x):
    # nn.GELU() default (approximate='none'): 0.5*x*(1+erf(x/sqrt(2)))
    return 0.5 * x * (1.0 + jax.lax.erf(x * (1.0 / math.sqrt(2.0))))


def ff_encoder_kernel(nk,
                      x_ref,
                      w1_ref, b1_ref, g1_ref, be1_ref,
                      w2_ref, b2_ref,
                      w3_ref, b3_ref, g2_ref, be2_ref,
                      o_ref):
    # ---- lin1 -> LayerNorm -> tanh (bf16 matmul inputs, f32 accumulation) ----
    h = jnp.dot(x_ref[...].astype(jnp.bfloat16), w1_ref[...],
                preferred_element_type=jnp.float32) + b1_ref[...]
    h = _layernorm(h, g1_ref[...], be1_ref[...])
    h = jnp.tanh(h)
    h_bf = h.astype(jnp.bfloat16)

    tb, hidden = h.shape

    # ---- lin2 -> GELU -> lin3, K-tiled over ff chunks, f32 accumulator ----
    # b2/w2/w3 chunks are read inside the loop because they are per-chunk;
    # b3 / gamma / beta are loaded once, outside the loop.
    def body(k, acc):
        f = jnp.dot(h_bf, w2_ref[k],
                    preferred_element_type=jnp.float32) + b2_ref[k]
        f = _gelu_exact(f)
        return acc + jnp.dot(f.astype(jnp.bfloat16), w3_ref[k],
                             preferred_element_type=jnp.float32)

    xx = jax.lax.fori_loop(0, nk, body,
                           jnp.zeros((tb, hidden), jnp.float32),
                           unroll=True)
    xx = xx + b3_ref[...]

    # ---- residual (on h, matching the PyTorch forward) + LayerNorm ----
    o = _layernorm(h + xx, g2_ref[...], be2_ref[...])
    o_ref[...] = o.astype(o_ref.dtype)


def feed_forward_encoder(x, params, *, tb=None, ff_chunk=None):
    """x: (B, input_size) f32. params: dict of f32 weights (see init_params)."""
    B, In = x.shape
    H = params["w1"].shape[1]
    FF = params["w2"].shape[1]

    # ---- choose ff chunk (K-tile) ----
    if ff_chunk is None:
        ff_chunk = FF
        for c in (512, 256, 128):
            if FF % c == 0:
                ff_chunk = c
                break
    assert FF % ff_chunk == 0, "ff_size must be divisible by ff_chunk"
    nk = FF // ff_chunk

    # ---- choose batch tile (multiple of 8 sublanes) and pad batch ----
    if tb is None:
        tb = 256
    tb = max(8, (min(tb, max(B, 8) + 7) // 8) * 8)
    num_tiles = pl.cdiv(B, tb)
    B_pad = num_tiles * tb
    if B_pad != B:
        x = jnp.pad(x, ((0, B_pad - B), (0, 0)))

    # ---- weight packing: bf16 storage, ff dimension pre-chunked ----
    w1 = params["w1"].astype(jnp.bfloat16)                                   # (In, H)
    w2 = params["w2"].reshape(H, nk, ff_chunk).transpose(1, 0, 2)            # (nk, H, FC)
    w2 = w2.astype(jnp.bfloat16)
    w3 = params["w3"].reshape(nk, ff_chunk, H).astype(jnp.bfloat16)          # (nk, FC, H)
    b2 = params["b2"].reshape(nk, 1, ff_chunk)                               # (nk, 1, FC) f32

    # ---- VMEM budget (resident weights + double-buffered io tiles) ----
    w_bytes = (In * H + H * FF + FF * H) * 2
    p_bytes = (6 * H + FF) * 4
    io_bytes = 2 * tb * (In + H) * 4
    scratch_bytes = tb * (4 * H + 2 * ff_chunk) * 4
    need = w_bytes + p_bytes + io_bytes + scratch_bytes
    vmem_limit = int(min(48 * 1024 * 1024, max(32 * 1024 * 1024, 2 * need)))

    cost = pl.CostEstimate(
        flops=2 * B_pad * (In * H + 2 * H * FF),
        transcendentals=B_pad * (H + FF),
        bytes_accessed=B_pad * (In + H) * 4 + w_bytes + p_bytes,
    )

    resident2 = lambda i: (0, 0)
    resident3 = lambda i: (0, 0, 0)
    kernel = functools.partial(ff_encoder_kernel, nk)

    out = pl.pallas_call(
        kernel,
        out_shape=jax.ShapeDtypeStruct((B_pad, H), x.dtype),
        grid=(num_tiles,),
        in_specs=[
            pl.BlockSpec((tb, In), lambda i: (i, 0)),          # x: streamed per tile
            pl.BlockSpec((In, H), resident2),                  # w1 (bf16, resident)
            pl.BlockSpec((1, H), resident2),                   # b1
            pl.BlockSpec((1, H), resident2),                   # g1
            pl.BlockSpec((1, H), resident2),                   # be1
            pl.BlockSpec((nk, H, ff_chunk), resident3),        # w2 chunks (bf16)
            pl.BlockSpec((nk, 1, ff_chunk), resident3),        # b2 chunks
            pl.BlockSpec((nk, ff_chunk, H), resident3),        # w3 chunks (bf16)
            pl.BlockSpec((1, H), resident2),                   # b3
            pl.BlockSpec((1, H), resident2),                   # g2
            pl.BlockSpec((1, H), resident2),                   # be2
        ],
        out_specs=pl.BlockSpec((tb, H), lambda i: (i, 0)),
        compiler_params=pltpu.CompilerParams(
            dimension_semantics=("parallel",),
            vmem_limit_bytes=vmem_limit,
        ),
        cost_estimate=cost,
    )(x, w1, params["b1"], params["g1"], params["be1"],
      w2, b2, w3, params["b3"], params["g2"], params["be2"])

    return out[:B]


# ----------------------------- init & reference -----------------------------

def _xavier_uniform(key, fan_in, fan_out, gain):
    bound = gain * math.sqrt(6.0 / (fan_in + fan_out))
    # stored (in, out) = PyTorch weight (out, in) transposed
    return jax.random.uniform(key, (fan_in, fan_out), jnp.float32, -bound, bound)


def _linear_bias(key, fan_in, size):
    bound = 1.0 / math.sqrt(fan_in)
    return jax.random.uniform(key, (1, size), jnp.float32, -bound, bound)


def init_params(key, input_size, hidden_size, ff_size):
    k = jax.random.split(key, 6)
    gain_tanh = 5.0 / 3.0          # nn.init.calculate_gain('tanh')
    gain_relu = math.sqrt(2.0)     # nn.init.calculate_gain('relu')
    return {
        "w1": _xavier_uniform(k[0], input_size, hidden_size, gain_tanh),
        "b1": _linear_bias(k[1], input_size, hidden_size),
        "g1": jnp.ones((1, hidden_size), jnp.float32),
        "be1": jnp.zeros((1, hidden_size), jnp.float32),
        "w2": _xavier_uniform(k[2], hidden_size, ff_size, gain_relu),
        "b2": _linear_bias(k[3], hidden_size, ff_size),
        "w3": _xavier_uniform(k[4], ff_size, hidden_size, gain_relu),
        "b3": _linear_bias(k[5], ff_size, hidden_size),
        "g2": jnp.ones((1, hidden_size), jnp.float32),
        "be2": jnp.zeros((1, hidden_size), jnp.float32),
    }


def _reference(x, p, *, bf16_matmul=True):
    # Pure-JAX reference. bf16_matmul=True mirrors the kernel's MXU dtype.
    def dot(a, b):
        if bf16_matmul:
            a = a.astype(jnp.bfloat16)
            b = b.astype(jnp.bfloat16)
        return jnp.dot(a, b, preferred_element_type=jnp.float32)

    h = dot(x, p["w1"]) + p["b1"]
    h = _layernorm(h, p["g1"], p["be1"])
    h = jnp.tanh(h)
    f = _gelu_exact(dot(h, p["w2"]) + p["b2"])
    xx = dot(f, p["w3"]) + p["b3"]
    return _layernorm(h + xx, p["g2"], p["be2"])


if __name__ == "__main__":
    key = jax.random.PRNGKey(0)
    kx, kp = jax.random.split(key)

    # Small but lane-friendly sizes (multiples of 128 on the feature axes).
    input_size, hidden_size, ff_size = 128, 128, 256
    batch = 40   # not a multiple of the batch tile -> exercises padding

    x = jax.random.normal(kx, (batch, input_size), jnp.float32)
    params = init_params(kp, input_size, hidden_size, ff_size)

    # tb=16 -> grid of 3 batch tiles; ff_chunk=128 -> nk=2 K-loop iterations.
    out = feed_forward_encoder(x, params, tb=16, ff_chunk=128)
    out = jax.block_until_ready(out)

    assert out.shape == (batch, hidden_size)

    # Tight check vs a reference that mirrors the kernel's bf16-matmul math.
    ref_bf16 = _reference(x, params, bf16_matmul=True)
    assert jnp.allclose(out, ref_bf16, atol=2e-3, rtol=2e-3), \
        "mismatch vs bf16-matmul reference"

    # Loose sanity check vs the full-f32 reference (bf16 rounding tolerance).
    ref_f32 = _reference(x, params, bf16_matmul=False)
    assert jnp.allclose(out, ref_f32, atol=1e-1, rtol=1e-1), \
        "mismatch vs f32 reference"

    print("KERNEL_OK")
</pallas_src>

<mosaic_0001>
module attributes {stable_mosaic.version = 11 : i64} {
  func.func @ff_encoder_kernel(%arg0: i32, %arg1: memref<16x128xf32, #tpu.memory_space<vmem>>, %arg2: memref<128x128xbf16, #tpu.memory_space<vmem>>, %arg3: memref<1x128xf32, #tpu.memory_space<vmem>>, %arg4: memref<1x128xf32, #tpu.memory_space<vmem>>, %arg5: memref<1x128xf32, #tpu.memory_space<vmem>>, %arg6: memref<2x128x128xbf16, #tpu.memory_space<vmem>>, %arg7: memref<2x1x128xf32, #tpu.memory_space<vmem>>, %arg8: memref<2x128x128xbf16, #tpu.memory_space<vmem>>, %arg9: memref<1x128xf32, #tpu.memory_space<vmem>>, %arg10: memref<1x128xf32, #tpu.memory_space<vmem>>, %arg11: memref<1x128xf32, #tpu.memory_space<vmem>>, %arg12: memref<16x128xf32, #tpu.memory_space<vmem>>) attributes {dimension_semantics = [#tpu.dimension_semantics<parallel>], iteration_bounds = array<i64: 3>, scalar_prefetch = 0 : i64, scratch_operands = 0 : i64, tpu.core_type = #tpu.core_type<tc>, window_params = [{transform_indices = @transform_0, window_bounds = array<i64: 16, 128>}, {pipeline_mode = #tpu.pipeline_mode<synchronous>, transform_indices = @transform_1, window_bounds = array<i64: 128, 128>}, {pipeline_mode = #tpu.pipeline_mode<synchronous>, transform_indices = @transform_2, window_bounds = array<i64: 1, 128>}, {pipeline_mode = #tpu.pipeline_mode<synchronous>, transform_indices = @transform_3, window_bounds = array<i64: 1, 128>}, {pipeline_mode = #tpu.pipeline_mode<synchronous>, transform_indices = @transform_4, window_bounds = array<i64: 1, 128>}, {pipeline_mode = #tpu.pipeline_mode<synchronous>, transform_indices = @transform_5, window_bounds = array<i64: 2, 128, 128>}, {pipeline_mode = #tpu.pipeline_mode<synchronous>, transform_indices = @transform_6, window_bounds = array<i64: 2, 1, 128>}, {pipeline_mode = #tpu.pipeline_mode<synchronous>, transform_indices = @transform_7, window_bounds = array<i64: 2, 128, 128>}, {pipeline_mode = #tpu.pipeline_mode<synchronous>, transform_indices = @transform_8, window_bounds = array<i64: 1, 128>}, {pipeline_mode = #tpu.pipeline_mode<synchronous>, transform_indices = @transform_9, window_bounds = array<i64: 1, 128>}, {pipeline_mode = #tpu.pipeline_mode<synchronous>, transform_indices = @transform_10, window_bounds = array<i64: 1, 128>}, {transform_indices = @transform_11, window_bounds = array<i64: 16, 128>}]} {
    %c0 = arith.constant 0 : index
    %c0_0 = arith.constant 0 : index
    %0 = vector.load %arg1[%c0, %c0_0] : memref<16x128xf32, #tpu.memory_space<vmem>>, vector<16x128xf32>
    %1 = arith.truncf %0 : vector<16x128xf32> to vector<16x128xbf16>
    %c0_1 = arith.constant 0 : index
    %c0_2 = arith.constant 0 : index
    %2 = vector.load %arg2[%c0_1, %c0_2] : memref<128x128xbf16, #tpu.memory_space<vmem>>, vector<128x128xbf16>
    %cst = arith.constant dense<0.000000e+00> : vector<16x128xf32>
    %3 = tpu.matmul %1, %2, %cst {dimension_numbers = #tpu.dot_dimension_numbers<[1], [0], [0], [1], [0, 0, 1, 1], [], []>} : vector<16x128xbf16>, vector<128x128xbf16>, vector<16x128xf32> -> vector<16x128xf32>
    %c0_3 = arith.constant 0 : index
    %c0_4 = arith.constant 0 : index
    %4 = vector.load %arg3[%c0_3, %c0_4] : memref<1x128xf32, #tpu.memory_space<vmem>>, vector<1x128xf32>
    %5 = vector.broadcast %4 : vector<1x128xf32> to vector<16x128xf32>
    %6 = arith.addf %3, %5 : vector<16x128xf32>
    %c0_5 = arith.constant 0 : index
    %c0_6 = arith.constant 0 : index
    %7 = vector.load %arg4[%c0_5, %c0_6] : memref<1x128xf32, #tpu.memory_space<vmem>>, vector<1x128xf32>
    %c0_7 = arith.constant 0 : index
    %c0_8 = arith.constant 0 : index
    %8 = vector.load %arg5[%c0_7, %c0_8] : memref<1x128xf32, #tpu.memory_space<vmem>>, vector<1x128xf32>
    %cst_9 = arith.constant dense<0.000000e+00> : vector<16xf32>
    %9 = vector.multi_reduction <add>, %6, %cst_9 [1] : vector<16x128xf32> to vector<16xf32>
    %10 = vector.shape_cast %9 : vector<16xf32> to vector<16x1xf32>
    %cst_10 = arith.constant 1.280000e+02 : f32
    %11 = vector.broadcast %cst_10 : f32 to vector<16x1xf32>
    %12 = arith.divf %10, %11 : vector<16x1xf32>
    %13 = vector.broadcast %12 : vector<16x1xf32> to vector<16x128xf32>
    %14 = arith.subf %6, %13 : vector<16x128xf32>
    %15 = arith.mulf %14, %14 : vector<16x128xf32>
    %cst_11 = arith.constant dense<0.000000e+00> : vector<16xf32>
    %16 = vector.multi_reduction <add>, %15, %cst_11 [1] : vector<16x128xf32> to vector<16xf32>
    %17 = vector.shape_cast %16 : vector<16xf32> to vector<16x1xf32>
    %cst_12 = arith.constant 1.280000e+02 : f32
    %18 = vector.broadcast %cst_12 : f32 to vector<16x1xf32>
    %19 = arith.divf %17, %18 : vector<16x1xf32>
    %20 = vector.broadcast %12 : vector<16x1xf32> to vector<16x128xf32>
    %21 = arith.subf %6, %20 : vector<16x128xf32>
    %cst_13 = arith.constant 9.99999974E-6 : f32
    %22 = vector.broadcast %cst_13 : f32 to vector<16x1xf32>
    %23 = arith.addf %19, %22 : vector<16x1xf32>
    %24 = math.rsqrt %23 : vector<16x1xf32>
    %25 = vector.broadcast %24 : vector<16x1xf32> to vector<16x128xf32>
    %26 = arith.mulf %21, %25 : vector<16x128xf32>
    %27 = vector.broadcast %7 : vector<1x128xf32> to vector<16x128xf32>
    %28 = arith.mulf %26, %27 : vector<16x128xf32>
    %29 = vector.broadcast %8 : vector<1x128xf32> to vector<16x128xf32>
    %30 = arith.addf %28, %29 : vector<16x128xf32>
    %31 = math.tanh %30 : vector<16x128xf32>
    %32 = arith.truncf %31 : vector<16x128xf32> to vector<16x128xbf16>
    %cst_14 = arith.constant 0.000000e+00 : f32
    %33 = vector.broadcast %cst_14 : f32 to vector<16x128xf32>
    %c0_i32 = arith.constant 0 : i32
    %34 = arith.index_cast %c0_i32 : i32 to index
    %c0_15 = arith.constant 0 : index
    %c0_16 = arith.constant 0 : index
    %35 = vector.load %arg6[%34, %c0_15, %c0_16] : memref<2x128x128xbf16, #tpu.memory_space<vmem>>, vector<1x128x128xbf16>
    %36 = vector.shape_cast %35 : vector<1x128x128xbf16> to vector<128x128xbf16>
    %cst_17 = arith.constant dense<0.000000e+00> : vector<16x128xf32>
    %37 = tpu.matmul %32, %36, %cst_17 {dimension_numbers = #tpu.dot_dimension_numbers<[1], [0], [0], [1], [0, 0, 1, 1], [], []>} : vector<16x128xbf16>, vector<128x128xbf16>, vector<16x128xf32> -> vector<16x128xf32>
    %38 = arith.index_cast %c0_i32 : i32 to index
    %c0_18 = arith.constant 0 : index
    %c0_19 = arith.constant 0 : index
    %39 = vector.load %arg7[%38, %c0_18, %c0_19] : memref<2x1x128xf32, #tpu.memory_space<vmem>>, vector<1x1x128xf32>
    %40 = vector.shape_cast %39 : vector<1x1x128xf32> to vector<1x128xf32>
    %41 = vector.broadcast %40 : vector<1x128xf32> to vector<16x128xf32>
    %42 = arith.addf %37, %41 : vector<16x128xf32>
    %cst_20 = arith.constant 5.000000e-01 : f32
    %43 = vector.broadcast %cst_20 : f32 to vector<16x128xf32>
    %44 = arith.mulf %43, %42 : vector<16x128xf32>
    %cst_21 = arith.constant 0.707106769 : f32
    %45 = vector.broadcast %cst_21 : f32 to vector<16x128xf32>
    %46 = arith.mulf %42, %45 : vector<16x128xf32>
    %47 = math.erf %46 : vector<16x128xf32>
    %cst_22 = arith.constant 1.000000e+00 : f32
    %48 = vector.broadcast %cst_22 : f32 to vector<16x128xf32>
    %49 = arith.addf %48, %47 : vector<16x128xf32>
    %50 = arith.mulf %44, %49 : vector<16x128xf32>
    %51 = arith.truncf %50 : vector<16x128xf32> to vector<16x128xbf16>
    %52 = arith.index_cast %c0_i32 : i32 to index
    %c0_23 = arith.constant 0 : index
    %c0_24 = arith.constant 0 : index
    %53 = vector.load %arg8[%52, %c0_23, %c0_24] : memref<2x128x128xbf16, #tpu.memory_space<vmem>>, vector<1x128x128xbf16>
    %54 = vector.shape_cast %53 : vector<1x128x128xbf16> to vector<128x128xbf16>
    %cst_25 = arith.constant dense<0.000000e+00> : vector<16x128xf32>
    %55 = tpu.matmul %51, %54, %cst_25 {dimension_numbers = #tpu.dot_dimension_numbers<[1], [0], [0], [1], [0, 0, 1, 1], [], []>} : vector<16x128xbf16>, vector<128x128xbf16>, vector<16x128xf32> -> vector<16x128xf32>
    %56 = arith.addf %33, %55 : vector<16x128xf32>
    %c1_i32 = arith.constant 1 : i32
    %57 = arith.index_cast %c1_i32 : i32 to index
    %c0_26 = arith.constant 0 : index
    %c0_27 = arith.constant 0 : index
    %58 = vector.load %arg6[%57, %c0_26, %c0_27] : memref<2x128x128xbf16, #tpu.memory_space<vmem>>, vector<1x128x128xbf16>
    %59 = vector.shape_cast %58 : vector<1x128x128xbf16> to vector<128x128xbf16>
    %cst_28 = arith.constant dense<0.000000e+00> : vector<16x128xf32>
    %60 = tpu.matmul %32, %59, %cst_28 {dimension_numbers = #tpu.dot_dimension_numbers<[1], [0], [0], [1], [0, 0, 1, 1], [], []>} : vector<16x128xbf16>, vector<128x128xbf16>, vector<16x128xf32> -> vector<16x128xf32>
    %61 = arith.index_cast %c1_i32 : i32 to index
    %c0_29 = arith.constant 0 : index
    %c0_30 = arith.constant 0 : index
    %62 = vector.load %arg7[%61, %c0_29, %c0_30] : memref<2x1x128xf32, #tpu.memory_space<vmem>>, vector<1x1x128xf32>
    %63 = vector.shape_cast %62 : vector<1x1x128xf32> to vector<1x128xf32>
    %64 = vector.broadcast %63 : vector<1x128xf32> to vector<16x128xf32>
    %65 = arith.addf %60, %64 : vector<16x128xf32>
    %cst_31 = arith.constant 5.000000e-01 : f32
    %66 = vector.broadcast %cst_31 : f32 to vector<16x128xf32>
    %67 = arith.mulf %66, %65 : vector<16x128xf32>
    %cst_32 = arith.constant 0.707106769 : f32
    %68 = vector.broadcast %cst_32 : f32 to vector<16x128xf32>
    %69 = arith.mulf %65, %68 : vector<16x128xf32>
    %70 = math.erf %69 : vector<16x128xf32>
    %cst_33 = arith.constant 1.000000e+00 : f32
    %71 = vector.broadcast %cst_33 : f32 to vector<16x128xf32>
    %72 = arith.addf %71, %70 : vector<16x128xf32>
    %73 = arith.mulf %67, %72 : vector<16x128xf32>
    %74 = arith.truncf %73 : vector<16x128xf32> to vector<16x128xbf16>
    %75 = arith.index_cast %c1_i32 : i32 to index
    %c0_34 = arith.constant 0 : index
    %c0_35 = arith.constant 0 : index
    %76 = vector.load %arg8[%75, %c0_34, %c0_35] : memref<2x128x128xbf16, #tpu.memory_space<vmem>>, vector<1x128x128xbf16>
    %77 = vector.shape_cast %76 : vector<1x128x128xbf16> to vector<128x128xbf16>
    %cst_36 = arith.constant dense<0.000000e+00> : vector<16x128xf32>
    %78 = tpu.matmul %74, %77, %cst_36 {dimension_numbers = #tpu.dot_dimension_numbers<[1], [0], [0], [1], [0, 0, 1, 1], [], []>} : vector<16x128xbf16>, vector<128x128xbf16>, vector<16x128xf32> -> vector<16x128xf32>
    %79 = arith.addf %56, %78 : vector<16x128xf32>
    %c2_i32 = arith.constant 2 : i32
    %c0_37 = arith.constant 0 : index
    %c0_38 = arith.constant 0 : index
    %80 = vector.load %arg9[%c0_37, %c0_38] : memref<1x128xf32, #tpu.memory_space<vmem>>, vector<1x128xf32>
    %81 = vector.broadcast %80 : vector<1x128xf32> to vector<16x128xf32>
    %82 = arith.addf %79, %81 : vector<16x128xf32>
    %83 = arith.addf %31, %82 : vector<16x128xf32>
    %c0_39 = arith.constant 0 : index
    %c0_40 = arith.constant 0 : index
    %84 = vector.load %arg10[%c0_39, %c0_40] : memref<1x128xf32, #tpu.memory_space<vmem>>, vector<1x128xf32>
    %c0_41 = arith.constant 0 : index
    %c0_42 = arith.constant 0 : index
    %85 = vector.load %arg11[%c0_41, %c0_42] : memref<1x128xf32, #tpu.memory_space<vmem>>, vector<1x128xf32>
    %cst_43 = arith.constant dense<0.000000e+00> : vector<16xf32>
    %86 = vector.multi_reduction <add>, %83, %cst_43 [1] : vector<16x128xf32> to vector<16xf32>
    %87 = vector.shape_cast %86 : vector<16xf32> to vector<16x1xf32>
    %cst_44 = arith.constant 1.280000e+02 : f32
    %88 = vector.broadcast %cst_44 : f32 to vector<16x1xf32>
    %89 = arith.divf %87, %88 : vector<16x1xf32>
    %90 = vector.broadcast %89 : vector<16x1xf32> to vector<16x128xf32>
    %91 = arith.subf %83, %90 : vector<16x128xf32>
    %92 = arith.mulf %91, %91 : vector<16x128xf32>
    %cst_45 = arith.constant dense<0.000000e+00> : vector<16xf32>
    %93 = vector.multi_reduction <add>, %92, %cst_45 [1] : vector<16x128xf32> to vector<16xf32>
    %94 = vector.shape_cast %93 : vector<16xf32> to vector<16x1xf32>
    %cst_46 = arith.constant 1.280000e+02 : f32
    %95 = vector.broadcast %cst_46 : f32 to vector<16x1xf32>
    %96 = arith.divf %94, %95 : vector<16x1xf32>
    %97 = vector.broadcast %89 : vector<16x1xf32> to vector<16x128xf32>
    %98 = arith.subf %83, %97 : vector<16x128xf32>
    %cst_47 = arith.constant 9.99999974E-6 : f32
    %99 = vector.broadcast %cst_47 : f32 to vector<16x1xf32>
    %100 = arith.addf %96, %99 : vector<16x1xf32>
    %101 = math.rsqrt %100 : vector<16x1xf32>
    %102 = vector.broadcast %101 : vector<16x1xf32> to vector<16x128xf32>
    %103 = arith.mulf %98, %102 : vector<16x128xf32>
    %104 = vector.broadcast %84 : vector<1x128xf32> to vector<16x128xf32>
    %105 = arith.mulf %103, %104 : vector<16x128xf32>
    %106 = vector.broadcast %85 : vector<1x128xf32> to vector<16x128xf32>
    %107 = arith.addf %105, %106 : vector<16x128xf32>
    %c0_48 = arith.constant 0 : index
    %c0_49 = arith.constant 0 : index
    %108 = vector.load %arg12[%c0_48, %c0_49] : memref<16x128xf32, #tpu.memory_space<vmem>>, vector<16x128xf32>
    tpu.vector_store %arg12[%c0_48, %c0_49], %107 {strides = array<i32>} : memref<16x128xf32, #tpu.memory_space<vmem>>, vector<16x128xf32>,
    return
  }
  func.func @transform_0(%arg0: i32) -> (i32, i32) {
    %c0_i32 = arith.constant 0 : i32
    %c0_i32_0 = arith.constant 0 : i32
    return %arg0, %c0_i32 : i32, i32
  }
  func.func @transform_1(%arg0: i32) -> (i32, i32) {
    %c0_i32 = arith.constant 0 : i32
    %c0_i32_0 = arith.constant 0 : i32
    %c0_i32_1 = arith.constant 0 : i32
    return %c0_i32, %c0_i32_0 : i32, i32
  }
  func.func @transform_2(%arg0: i32) -> (i32, i32) {
    %c0_i32 = arith.constant 0 : i32
    %c0_i32_0 = arith.constant 0 : i32
    %c0_i32_1 = arith.constant 0 : i32
    return %c0_i32, %c0_i32_0 : i32, i32
  }
  func.func @transform_3(%arg0: i32) -> (i32, i32) {
    %c0_i32 = arith.constant 0 : i32
    %c0_i32_0 = arith.constant 0 : i32
    %c0_i32_1 = arith.constant 0 : i32
    return %c0_i32, %c0_i32_0 : i32, i32
  }
  func.func @transform_4(%arg0: i32) -> (i32, i32) {
    %c0_i32 = arith.constant 0 : i32
    %c0_i32_0 = arith.constant 0 : i32
    %c0_i32_1 = arith.constant 0 : i32
    return %c0_i32, %c0_i32_0 : i32, i32
  }
  func.func @transform_5(%arg0: i32) -> (i32, i32, i32) {
    %c0_i32 = arith.constant 0 : i32
    %c0_i32_0 = arith.constant 0 : i32
    %c0_i32_1 = arith.constant 0 : i32
    %c0_i32_2 = arith.constant 0 : i32
    return %c0_i32, %c0_i32_0, %c0_i32_1 : i32, i32, i32
  }
  func.func @transform_6(%arg0: i32) -> (i32, i32, i32) {
    %c0_i32 = arith.constant 0 : i32
    %c0_i32_0 = arith.constant 0 : i32
    %c0_i32_1 = arith.constant 0 : i32
    %c0_i32_2 = arith.constant 0 : i32
    return %c0_i32, %c0_i32_0, %c0_i32_1 : i32, i32, i32
  }
  func.func @transform_7(%arg0: i32) -> (i32, i32, i32) {
    %c0_i32 = arith.constant 0 : i32
    %c0_i32_0 = arith.constant 0 : i32
    %c0_i32_1 = arith.constant 0 : i32
    %c0_i32_2 = arith.constant 0 : i32
    return %c0_i32, %c0_i32_0, %c0_i32_1 : i32, i32, i32
  }
  func.func @transform_8(%arg0: i32) -> (i32, i32) {
    %c0_i32 = arith.constant 0 : i32
    %c0_i32_0 = arith.constant 0 : i32
    %c0_i32_1 = arith.constant 0 : i32
    return %c0_i32, %c0_i32_0 : i32, i32
  }
  func.func @transform_9(%arg0: i32) -> (i32, i32) {
    %c0_i32 = arith.constant 0 : i32
    %c0_i32_0 = arith.constant 0 : i32
    %c0_i32_1 = arith.constant 0 : i32
    return %c0_i32, %c0_i32_0 : i32, i32
  }
  func.func @transform_10(%arg0: i32) -> (i32, i32) {
    %c0_i32 = arith.constant 0 : i32
    %c0_i32_0 = arith.constant 0 : i32
    %c0_i32_1 = arith.constant 0 : i32
    return %c0_i32, %c0_i32_0 : i32, i32
  }
  func.func @transform_11(%arg0: i32) -> (i32, i32) {
    %c0_i32 = arith.constant 0 : i32
    %c0_i32_0 = arith.constant 0 : i32
    return %arg0, %c0_i32 : i32, i32
  }
}

</mosaic_0001>

<bundles_post_ra>
// kernel: tpu_custom_call.1
= control target key start
LH: loop header
LB: loop body
LE: loop exit
PB: predicated region body
PF: predicated region fallthrough
CT: control target
= control target key end

     0   :  { %s2151_s0 = inlined_call_operand.hbm [shape: f32[48,128], index: 0, kind: input, shape index: {}]   ;;  %s2152_s1 = inlined_call_operand.hbm [shape: bf16[128,128], index: 1, kind: input, shape index: {}]   ;;  %s2153_s2 = inlined_call_operand.vmem [shape: f32[1,128], index: 2, kind: input, shape index: {}]   ;;  %s2154_s3 = inlined_call_operand.vmem [shape: f32[1,128], index: 3, kind: input, shape index: {}]   ;;  %s2155_s4 = inlined_call_operand.vmem [shape: f32[1,128], index: 4, kind: input, shape index: {}]   ;;  %s2156_s5 = inlined_call_operand.hbm [shape: bf16[2,128,128], index: 5, kind: input, shape index: {}]   ;;  %s2157_s6 = inlined_call_operand.vmem [shape: f32[2,1,128], index: 6, kind: input, shape index: {}]   ;;  %s2158_s7 = inlined_call_operand.hbm [shape: bf16[2,128,128], index: 7, kind: input, shape index: {}]   ;;  %s2159_s8 = inlined_call_operand.vmem [shape: f32[1,128], index: 8, kind: input, shape index: {}]   ;;  %s2160_s9 = inlined_call_operand.vmem [shape: f32[1,128], index: 9, kind: input, shape index: {}]   ;;  %s2161_s10 = inlined_call_operand.vmem [shape: f32[1,128], index: 10, kind: input, shape index: {}]   ;;  %s2162_s11 = inlined_call_operand.hbm [shape: f32[48,128], index: 11, kind: output, shape index: {}]  }
   0x1   :  { %2168 = sst [smem:[#allocation17_spill]] %s2152_s1 }
   0x2   :  { %2169 = sst [smem:[#allocation18_spill]] %s2156_s5 }
   0x3   :  { %2170 = sst [smem:[#allocation19_spill]] %s2158_s7 }
   0x4   :  { %16 = vsyncpa [#allocation3], 0 }
   0x5   :  { %18 = vsyncpa [#allocation3 + $0x1], 0 }
   0x6   :  { %19 = vsyncpa [#allocation6], 0 }
   0x7   :  { %20 = vsyncpa [#allocation9], 0 }
   0x8   :  { %21 = vsyncpa [#allocation4], 0 }
   0x9   :  { %23 = vsyncpa [#allocation4 + $0x1], 0  ;;  %s1853_s17 = smov 0   ;;  %s1855_s18 = smov 0  }
   0xa   :  { %s1857_s19 = smov 0   ;;  %s1859_s20 = smov 0  }
   0xb LB: > { %2171 = sst [smem:[#allocation15_spill]] %s1774_s19  ;;  %s1874_s21 = sadd.s32 4294967295, %s1778_s20   ;;  %s1778_s20 = sphi %s1859_s20, %s2196_s20   ;;  %s1774_s19 = sphi %s1857_s19, %s2195_s19   ;;  %s1770_s18 = sphi %s1855_s18, %s2194_s18   ;;  %s1766_s17 = sphi %s1853_s17, %s2193_s17  }
   0xc   : > { %s1239_s22 = sadd.s32 4294967294, %s1778_s20   ;;  %p49_p0 = scmp.ne.s32.totalorder %s1770_s18, %s1766_s17 }
   0xd   : > { %p2163_p1 = scmp.eq.s32.totalorder %s1874_s21, 0  ;;  %p289_p3 = scmp.eq.s32.totalorder %s1239_s22, 2 }
   0xe   : > { %p1240_p5 = scmp.ge.s32.totalorder %s1778_s20, 1  ;;  %p296_p7 = scmp.lt.s32.totalorder %s1778_s20, 4 }
   0xf   : > { %p1883_p4 = por %p2163_p1, %p49_p0  ;;  %p1888_p6 = por %p289_p3, %p49_p0 }
  0x10   : > { %p1893_p8 = pnand %p1240_p5, %p296_p7  ;;  %s1780_s26 = smov [#allocation5]  }
  0x11   : > { %s2172_s23 = scalar_select %p1883_p4, 1, 0 }
  0x12   : > { %s2173_s24 = scalar_select %p1888_p6, 1, 0 }
  0x13   : > { %s2174_s25 = scalar_select %p1893_p8, 1, 0 }
  0x14   : > { %s308_s27 = sshll.u32 %s1780_s26, 4  ;;  %p1471_p9 = pneg %p1893_p8  ;;  %s309_s27 = int_to_ptr.vmem [resolvable:$true] %s308_s27 }
  0x15   : > { %s1781_s29 = smov [#allocation7]   ;;  %s1782_s12 = smov [#allocation8]  }
  0x16   : > { %p1901_p10 = pnand %p1471_p9, %p2163_p1  ;;  %s330_s30 = sshll.u32 %s1781_s29, 4  ;;  %s331_s30 = int_to_ptr.vmem [resolvable:$true] %s330_s30 }
  0x17   : > { %s346_s13 = sshll.u32 %s1782_s12, 4  ;;  %s1611_s14 = scalar_lea.vmem %s309_s27, 1024  ;;  %s347_s13 = int_to_ptr.vmem [resolvable:$true] %s346_s13 }
  0x18   : > { %p1602_p11 = pneg %p1901_p10  ;;  %p1612_p12 = scmp.ne.s32.totalorder %s309_s27, %s1611_s14 }
  0x19   : > { %p1619_p3 = scmp.lt.s32.totalorder %s309_s27, %s309_s27  ;;  %p1620_p5 = scmp.lt.s32.totalorder %s1611_s14, %s1611_s14 }
  0x1a   : > { %p1614_p13 = pnand %p1612_p12, %p1602_p11 }
  0x1b   : > { %p1621_p7 = por %p1620_p5, %p1619_p3 }
  0x1c   : > { %p1615_p0 = pneg %p1614_p13 }
  0x1e   : > { %p1622_p9 = pnand %p1621_p7, %p1615_p0 }
  0x20   : > { %1625 = shalt.err (!%p1622_p9)
}
  0x21   : > { %s1783_s15 = smov 64   ;;  %s1784_s16 = smov 4  }
  0x22   : > { %s2176_s1 = sld [smem:[#allocation17_spill]]  ;;  %s1637_s29 = scalar_lea.vmem %s331_s30, 2048 }
  0x23   : > { %p1638_p1 = scmp.ne.s32.totalorder %s331_s30, %s1637_s29  ;;  %p1645_p2 = scmp.lt.s32.totalorder %s331_s30, %s331_s30 }
  0x24   : > { %p1646_p6 = scmp.lt.s32.totalorder %s1637_s29, %s1637_s29 }
  0x25   : > { %p1640_p12 = pnand %p1638_p1, %p1602_p11 }
  0x26   : > { %p1647_p3 = por %p1646_p6, %p1645_p2 }
  0x27   : > { %p1641_p13 = pneg %p1640_p12 }
  0x28   : > { %1474 = dma.hbm_to_vmem [thread:$0]  (!%p1901_p10), %s2176_s1, 1024, %s309_s27, [#allocation6], %s1783_s15, %s1783_s15, %s1784_s16  }
  0x29   : > { %p1648_p0 = pnand %p1647_p3, %p1641_p13 }
  0x2b   : > { %1651 = shalt.err (!%p1648_p0)
}
  0x2c   : > { %s2177_s5 = sld [smem:[#allocation18_spill]]  ;;  %s1663_s27 = scalar_lea.vmem %s347_s13, 2048 }
  0x2d   : > { %p1664_p5 = scmp.ne.s32.totalorder %s347_s13, %s1663_s27  ;;  %p1671_p9 = scmp.lt.s32.totalorder %s347_s13, %s347_s13 }
  0x2e   : > { %p1672_p12 = scmp.lt.s32.totalorder %s1663_s27, %s1663_s27 }
  0x2f   : > { %p1666_p7 = pnand %p1664_p5, %p1602_p11 }
  0x30   : > { %p1673_p4 = por %p1672_p12, %p1671_p9 }
  0x31   : > { %p1667_p1 = pneg %p1666_p7 }
  0x32   : > { %1477 = dma.hbm_to_vmem [thread:$0]  (!%p1901_p10), %s2177_s5, 2048, %s331_s30, [#allocation6], %s1783_s15, %s1783_s15, %s1784_s16  }
  0x33   : > { %p1674_p2 = pnand %p1673_p4, %p1667_p1 }
  0x35   : > { %1677 = shalt.err (!%p1674_p2)
}
  0x36   : > { %s2178_s7 = sld [smem:[#allocation19_spill]]  ;;  %s1932_s30 = sadd.s32 1, %s1778_s20  }
  0x37   : > { %s33_s29 = ssub.s32 %s1778_s20, %s1932_s30  ;;  %s36_s28 = sadd.s32 1, %s1774_s19 }
  0x38   : > { %p34_p4 = scmp.eq.s32.totalorder %s33_s29, 0  ;;  %p43_p6 = scmp.ne.s32.totalorder %s1774_s19, %s1770_s18 }
  0x39   : > { %p44_p11 = scmp.eq.s32.totalorder %s1778_s20, 0  ;;  %p1492_p13 = scmp.lt.s32.totalorder %s1778_s20, 3 }
  0x3a   : > { %s1942_s12 = scalar_select %p34_p4, %s1774_s19, %s36_s28  }
  0x3b   : > { %p45_p3 = por %p44_p11, %p43_p6  ;;  %p2180_p0 = scmp.eq.s32.totalorder %s1874_s21, 2 }
  0x3c   : > { %1480 = dma.hbm_to_vmem [thread:$0]  (!%p1901_p10), %s2178_s7, 2048, %s347_s13, [#allocation9], %s1783_s15, %s1783_s15, %s1784_s16  }
  0x3d   : > { %2179 = sst [smem:[#allocation16_spill]] %s1942_s12  ;;  %p1946_p5 = por %p2180_p0, %p43_p6 }
  0x3e   : > { %s369_s27 = sand.u32 1, %s1774_s19   ;;  %s1308_s22 = sshll.u32 %s1778_s20, 8 }
  0x3f   : > { %s2181_s14 = scalar_select %p1946_p5, 1, 0 }
  0x40   : > { %s1245_s13 = sshll.u32 %s369_s27, 4  ;;  %s1955_s26 = scalar_lea.hbm %s2151_s0, %s1308_s22 }
  0x41   : > { %s373_s29 = scalar_lea.vmem [#allocation2], %s1245_s13  ;;  %p1957_p10 = pnand %p1492_p13, %p45_p3 }
  0x42   : > { %s380_s28 = sshll.u32 %s373_s29, 4  ;;  %s1963_s5 = scalar_lea.sflag [#allocation3], %s369_s27  ;;  %s1961_s28 = int_to_ptr.vmem [resolvable:$true] %s380_s28 }
  0x43   : > { %s1678_s7 = scalar_lea.hbm %s1955_s26, 256  ;;  %p1680_p1 = pneg %p1957_p10 }
  0x44   : > { %p1679_p7 = scmp.ne.s32.totalorder %s1955_s26, %s1678_s7  ;;  %s1683_s13 = scalar_lea.hbm %s2151_s0, 768 }
  0x45   : > { %p1684_p2 = scmp.lt.s32.totalorder %s1955_s26, %s2151_s0  ;;  %p1685_p4 = scmp.lt.s32.totalorder %s1683_s13, %s1678_s7 }
  0x46   : > { %p1681_p9 = pnand %p1680_p1, %p1679_p7 }
  0x47   : > { %p1686_p6 = por %p1685_p4, %p1684_p2 }
  0x48   : > { %p1682_p12 = pneg %p1681_p9 }
  0x4a   : > { %p1687_p11 = pnand %p1686_p6, %p1682_p12 }
  0x4c   : > { %1690 = shalt.err (!%p1687_p11)
}
  0x4d   : > { %s1691_s27 = scalar_lea.vmem %s1961_s28, 256  ;;  %s1785_s12 = smov [#allocation2]  }
  0x4e   : > { %p1692_p13 = scmp.ne.s32.totalorder %s1961_s28, %s1691_s27  ;;  %s1696_s19 = sshll.u32 %s1785_s12, 4  ;;  %s1697_s19 = int_to_ptr.vmem [resolvable:$false] %s1696_s19 }
  0x4f   : > { %s1698_s22 = scalar_lea.vmem %s1697_s19, 512  ;;  %p1699_p7 = scmp.lt.s32.totalorder %s1961_s28, %s1697_s19 }
  0x50   : > { %p1694_p3 = pnand %p1692_p13, %p1680_p1  ;;  %p1700_p9 = scmp.lt.s32.totalorder %s1698_s22, %s1691_s27 }
  0x52   : > { %p1695_p0 = pneg %p1694_p3  ;;  %p1701_p5 = por %p1700_p9, %p1699_p7 }
  0x54   : > { %p1702_p8 = pnand %p1701_p5, %p1695_p0 }
  0x56   : > { %1705 = shalt.err (!%p1702_p8)
}
  0x57   : > { %s1786_s7 = smov 128   ;;  %s1787_s15 = smov 8  }
  0x58   : > { %1484 = dma.hbm_to_vmem [thread:$0]  (!%p1957_p10), %s1955_s26, 256, %s1961_s28, %s1963_s5, %s1786_s7, %s1786_s7, %s1787_s15  }
  0x59   : > { %p2183_p1 = scmp.ne.s32.totalorder %s2174_s25, 0 }
  0x5a   : > { %s1987_s12 = sand.u32 (!%p2183_p1), 1, %s1770_s18   ;;  %p2184_p8 = scmp.ne.s32.totalorder (!%p2183_p1), %s2172_s23, 0 }
  0x5b   : > { %392 = sbr.rel (%p2183_p1) target bundleno = 1403 (0x57b), region = 64  ;;  %s1249_s19 = sshll.u32 (!%p2183_p1), %s1987_s12, 4 }
  0x5c   : > { %s395_s13 = scalar_lea.sflag (!%p2183_p1), [#allocation3], %s1987_s12  ;;  %s1993_s16 = scalar_lea.vmem (!%p2183_p1), [#allocation2], %s1249_s19 }
  0x60   : > { %1749 = dma.done.wait (%p2184_p8), %s395_s13, 256  }
  0x61   : > { %1751 = vsyncadd (%p2184_p8), %s395_s13, 4294967040  ;;  %p2185_p5 = scmp.eq.s32.totalorder %s1874_s21, 0 }
  0x63   : > { %1753 = dma.done.wait (%p2185_p5), [#allocation6], 3072   ;;  %p2186_p10 = pmov %p2185_p5 }
  0x64   : > { %p2187_p12 = pmov %p2185_p5 }
  0x65   : > { %1755 = vsyncadd (%p2186_p10), [#allocation6], 4294964224 }
  0x66   : > { %1757 = dma.done.wait (%p2187_p12), [#allocation9], 2048   ;;  %p2188_p2 = pmov %p2185_p5 }
  0x67   : > { %v1788_v0 = vmov 0.0   ;;  %vm1789_vm0 = vmmov 0   ;;  %v1540_v1 = vld [vmem:[#allocation5 + $0x38] sm:$0xff]   ;;  %v1541_v2 = vld [vmem:[#allocation5 + $0x30] sm:$0xff]   ;;  %v1542_v3 = vld [vmem:[#allocation5 + $0x28] sm:$0xff]   ;;  %s1309_s25 = sshll.u32 %s1874_s21, 8 }
  0x68   : > { %1759 = vsyncadd (%p2188_p2), [#allocation9], 4294965248  ;;  %1355 = vmatprep.subr.bf16.mxu0 %v1788_v0  ;;  %1371 = vmatprep.mubr.msk.bf16.mxu0 %vm1789_vm0, %v1788_v0  ;;  %v1543_v4 = vld [vmem:[#allocation5 + $0x20] sm:$0xff]   ;;  %v1544_v5 = vld [vmem:[#allocation5 + $0x18] sm:$0xff]   ;;  %s448_s26 = scalar_lea.vmem [#allocation10], %s1249_s19  ;;  %s2107_s22 = scalar_lea.hbm %s2162_s11, %s1309_s25 }
  0x69   : > { %1375 = vmatprep.subr.bf16.mxu1 %v1788_v0  ;;  %1391 = vmatprep.mubr.msk.bf16.mxu1 %vm1789_vm0, %v1788_v0  ;;  %v1545_v6 = vld [vmem:[#allocation5 + $0x10] sm:$0xff]   ;;  %v1546_v7 = vld [vmem:[#allocation5 + $0x8] sm:$0xff]   ;;  %v1547_v8 = vld [vmem:[#allocation5] sm:$0xff]   ;;  %s1137_s28 = sshll.u32 %s448_s26, 4  ;;  %s1124_s7 = scalar_lea.sflag [#allocation4], %s1987_s12  ;;  %s2109_s28 = int_to_ptr.vmem [resolvable:$true] %s1137_s28 }
  0x6a   : > { %1356 = vmatpush3.bf16.msra.mxu0 %v1540_v1  ;;  %v452_v9 = vld [vmem:[%s1993_s16] sm:$0xff]  ;;  %v453_v10 = vld [vmem:[%s1993_s16 + $0x8] sm:$0xff]  ;;  %s1706_s15 = scalar_lea.vmem %s2109_s28, 256  ;;  %p2189_p6 = scmp.ne.s32.totalorder %s2181_s14, 0 }
  0x6b   : > { %1357 = vmatprep.subr.bf16.mxu0 %v1788_v0  ;;  %v454_v11 = vpack.c.bf16 %v453_v10, %v452_v9  ;;  %v1254_v12 = vld [vmem:[%s2153_s2] ss:$0 sm:$0xff]  ;;  %v1548_v27 = vld [vmem:[#allocation7 + $0x38] sm:$0xff]   ;;  %v1550_v29 = vld [vmem:[#allocation7 + $0x30] sm:$0xff]   ;;  %p1707_p4 = scmp.ne.s32.totalorder %s2109_s28, %s1706_s15  ;;  %s1790_s21 = smov [#allocation10]  }
  0x6c   : > { %v1549_v28 = vld [vmem:[#allocation7 + $0x78] sm:$0xff]   ;;  %1376 = vmatpush3.bf16.msra.mxu1 %v1548_v27  ;;  %v1551_v30 = vld [vmem:[#allocation7 + $0x70] sm:$0xff]   ;;  %v1552_v31 = vld [vmem:[#allocation7 + $0x28] sm:$0xff]   ;;  %s1710_s19 = sshll.u32 %s1790_s21, 4  ;;  %s1711_s19 = int_to_ptr.vmem [resolvable:$false] %s1710_s19 }
  0x6d   : > { %1377 = vmatprep.subr.bf16.mxu1 %v1788_v0  ;;  %v1553_v32 = vld [vmem:[#allocation7 + $0x68] sm:$0xff]   ;;  %v1554_v33 = vld [vmem:[#allocation7 + $0x20] sm:$0xff]   ;;  %v1556_v35 = vld [vmem:[#allocation7 + $0x18] sm:$0xff]   ;;  %p1708_p11 = pnand %p1707_p4, %p2189_p6  ;;  %s1712_s13 = scalar_lea.vmem %s1711_s19, 512 }
  0x6e   : > { %1358 = vmatpush3.bf16.msra.mxu0 %v1541_v2  ;;  %v1555_v34 = vld [vmem:[#allocation7 + $0x60] sm:$0xff]   ;;  %v1557_v36 = vld [vmem:[#allocation7 + $0x58] sm:$0xff]   ;;  %v1558_v37 = vld [vmem:[#allocation7 + $0x10] sm:$0xff]   ;;  %p1713_p3 = scmp.lt.s32.totalorder %s2109_s28, %s1711_s19  ;;  %p1714_p0 = scmp.lt.s32.totalorder %s1712_s13, %s1706_s15 }
  0x6f   : > { %1359 = vmatprep.subr.bf16.mxu0 %v1788_v0  ;;  %v1559_v38 = vld [vmem:[#allocation7 + $0x50] sm:$0xff]   ;;  %v1560_v39 = vld [vmem:[#allocation7 + $0x8] sm:$0xff]   ;;  %v1562_v41 = vld [vmem:[#allocation7] sm:$0xff]   ;;  %p1709_p13 = pneg %p1708_p11 }
  0x70   : > { %1378 = vmatpush3.bf16.msra.mxu1 %v1550_v29  ;;  %v1561_v40 = vld [vmem:[#allocation7 + $0x48] sm:$0xff]   ;;  %v1563_v42 = vld [vmem:[#allocation7 + $0x40] sm:$0xff]   ;;  %v1564_v61 = vld [vmem:[#allocation8 + $0x78] sm:$0xff]   ;;  %p1715_p7 = por %p1714_p0, %p1713_p3 }
  0x71   : > { %1379 = vmatprep.subr.bf16.mxu1 %v1788_v0  ;;  %v1263_v50 = vld [vmem:[%s2154_s3] ss:$0 sm:$0xff]  ;;  %v1565_v62 = vld [vmem:[#allocation8 + $0x38] sm:$0xff]   ;;  %v1566_v1 = vld [vmem:[#allocation8 + $0x70] sm:$0xff]  }
  0x72   : > { %1360 = vmatpush3.bf16.msra.mxu0 %v1542_v3  ;;  %v1264_v53 = vld [vmem:[%s2155_s4] ss:$0 sm:$0xff]  ;;  %v1567_v2 = vld [vmem:[#allocation8 + $0x30] sm:$0xff]   ;;  %v1568_v3 = vld [vmem:[#allocation8 + $0x68] sm:$0xff]   ;;  %p1716_p9 = pnand %p1715_p7, %p1709_p13 }
  0x73   : > { %1361 = vmatprep.subr.bf16.mxu0 %v1788_v0  ;;  %v1574_v9 = vld [vmem:[#allocation8 + $0x50] sm:$0xff]  }
  0x74   : > { %1380 = vmatpush3.bf16.msra.mxu1 %v1552_v31  ;;  %v1575_v10 = vld [vmem:[#allocation8 + $0x10] sm:$0xff]  }
  0x75   : > { %1381 = vmatprep.subr.bf16.mxu1 %v1788_v0 }
  0x76   : > { %1362 = vmatpush3.bf16.msra.mxu0 %v1543_v4  ;;  %v1569_v4 = vld [vmem:[#allocation8 + $0x28] sm:$0xff]  }
  0x77   : > { %1363 = vmatprep.subr.bf16.mxu0 %v1788_v0 }
  0x78   : > { %1382 = vmatpush3.bf16.msra.mxu1 %v1554_v33 }
  0x79   : > { %1383 = vmatprep.subr.bf16.mxu1 %v1788_v0 }
  0x7a   : > { %1364 = vmatpush3.bf16.msra.mxu0 %v1544_v5  ;;  %v1570_v5 = vld [vmem:[#allocation8 + $0x60] sm:$0xff]  }
  0x7b   : > { %1365 = vmatprep.subr.bf16.mxu0 %v1788_v0 }
  0x7c   : > { %1384 = vmatpush3.bf16.msra.mxu1 %v1556_v35 }
  0x7d   : > { %1385 = vmatprep.subr.bf16.mxu1 %v1788_v0 }
  0x7e   : > { %1366 = vmatpush3.bf16.msra.mxu0 %v1545_v6  ;;  %v1571_v6 = vld [vmem:[#allocation8 + $0x20] sm:$0xff]  }
  0x7f   : > { %1367 = vmatprep.subr.bf16.mxu0 %v1788_v0 }
  0x80   : > { %1386 = vmatpush3.bf16.msra.mxu1 %v1558_v37 }
  0x81   : > { %1387 = vmatprep.subr.bf16.mxu1 %v1788_v0 }
  0x82   : > { %1368 = vmatpush3.bf16.msra.mxu0 %v1546_v7  ;;  %v1572_v7 = vld [vmem:[#allocation8 + $0x58] sm:$0xff]  }
  0x83   : > { %1369 = vmatprep.subr.bf16.mxu0 %v1788_v0 }
  0x84   : > { %1388 = vmatpush3.bf16.msra.mxu1 %v1560_v39 }
  0x85   : > { %1389 = vmatprep.subr.bf16.mxu1 %v1788_v0 }
  0x86   : > { %1370 = vmatpush3.bf16.msra.mxu0 %v1547_v8  ;;  %v1573_v8 = vld [vmem:[#allocation8 + $0x18] sm:$0xff]  }
  0x87   : > { %1395 = vmatprep.subr.bf16.mxu0 %v1788_v0 }
  0x88   : > { %1390 = vmatpush3.bf16.msra.mxu1 %v1562_v41 }
  0x89   : > { %1372 = vmatmul.mubr.bf16.vlgmr.msra.gmra.mxu0 %v454_v11  ;;  %1415 = vmatprep.subr.bf16.mxu1 %v1788_v0  ;;  %v1576_v11 = vld [vmem:[#allocation8 + $0x48] sm:$0xff]  }
  0x8a   : > { %1411 = vmatprep.mubr.msk.bf16.mxu0 %vm1789_vm0, %v1788_v0  ;;  %1396 = vmatpush3.bf16.msra.mxu0 %v1549_v28 }
  0x8b   : > { %1397 = vmatprep.subr.bf16.mxu0 %v1788_v0 }
  0x8e   : > { %1398 = vmatpush3.bf16.msra.mxu0 %v1551_v30 }
  0x8f   : > { %1399 = vmatprep.subr.bf16.mxu0 %v1788_v0 }
  0x92   : > { %1400 = vmatpush3.bf16.msra.mxu0 %v1553_v32 }
  0x93   : > { %1401 = vmatprep.subr.bf16.mxu0 %v1788_v0 }
  0x96   : > { %1402 = vmatpush3.bf16.msra.mxu0 %v1555_v34 }
  0x97   : > { %1403 = vmatprep.subr.bf16.mxu0 %v1788_v0 }
  0x9a   : > { %1404 = vmatpush3.bf16.msra.mxu0 %v1557_v36 }
  0x9b   : > { %1405 = vmatprep.subr.bf16.mxu0 %v1788_v0 }
  0x9e   : > { %1406 = vmatpush3.bf16.msra.mxu0 %v1559_v38 }
  0x9f   : > { %1407 = vmatprep.subr.bf16.mxu0 %v1788_v0 }
  0xa2   : > { %1408 = vmatpush3.bf16.msra.mxu0 %v1561_v40 }
  0xa3   : > { %1409 = vmatprep.subr.bf16.mxu0 %v1788_v0 }
  0xa6   : > { %1410 = vmatpush3.bf16.msra.mxu0 %v1563_v42 }
  0xa7   : > { %1435 = vmatprep.subr.bf16.mxu0 %v1788_v0 }
 0x149   : > { %v560_v13 = vpop.f32.mrf.mxu0 }
 0x14a   : > { %v561_v14 = vadd.f32 %v1254_v12, %v560_v13  ;;  %v1578_v13 = vld [vmem:[#allocation8 + $0x40] sm:$0xff]  }
 0x14b   : > { %v1373_v15 = vpop.f32.mrf.mxu0 }
 0x14c   : > { %569 = vadd.xlane.f32.xlu0 %v561_v14  ;;  %v1265_v15 = vld [vmem:[%s2157_s6] ss:$0 sm:$0xff] }
 0x14d   : > { %v563_v16 = vpop.f32.mrf.mxu0 }
 0x14e   : > { %v564_v17 = vadd.f32 %v1254_v12, %v563_v16  ;;  %v1577_v12 = vld [vmem:[#allocation8 + $0x8] sm:$0xff]   ;;  %v1275_v16 = vld [vmem:[%s2157_s6 + $0x1] ss:$0 sm:$0xff] }
 0x14f   : > { %v1374_v18 = vpop.f32.mrf.mxu0 }
 0x150   : > { %571 = vadd.xlane.f32.xlu0 %v564_v17 }
 0x1d5   : > { %v570_v19 = vpop.xlane.xlu0 %569 }
 0x1d6   : > { %v574_v20 = vmul.f32 0.0078125, %v570_v19 }
 0x1d8   : > { %v2028_v21 = vsub.f32 %v561_v14, %v574_v20  ;;  %v1579_v14 = vld [vmem:[#allocation8] sm:$0xff]  }
 0x1d9   : > { %v572_v22 = vpop.xlane.xlu0 %571 }
 0x1da   : > { %v575_v23 = vmul.f32 0.0078125, %v572_v22  ;;  %v578_v24 = vmul.f32 %v2028_v21, %v2028_v21 }
 0x1dc   : > { %v2032_v25 = vsub.f32 %v564_v17, %v575_v23  ;;  %580 = vadd.xlane.f32.xlu1 %v578_v24 }
 0x1de   : > { %v579_v26 = vmul.f32 %v2032_v25, %v2032_v25 }
 0x1e0   : > { %582 = vadd.xlane.f32.xlu1 %v579_v26 }
 0x265   : > { %v581_v43 = vpop.xlane.xlu1 %580 }
 0x266   : > { %v584_v44 = vmul.f32 0.0078125, %v581_v43 }
 0x268   : > { %v586_v45 = vadd.f32 1e-05, %v584_v44 }
 0x269   : > { %v583_v46 = vpop.xlane.xlu1 %582 }
 0x26a   : > { %1580 = vrsqrt.f32 %v586_v45  ;;  %v585_v47 = vmul.f32 0.0078125, %v583_v46 }
 0x26c   : > { %v587_v48 = vadd.f32 1e-05, %v585_v47 }
 0x26e   : > { %1582 = vrsqrt.f32 %v587_v48 }
 0x277   : > { %v1581_v49 = vpop.eup %1580 }
 0x278   : > { %v590_v51 = vmul.f32 %v1581_v49, %v2028_v21 }
 0x27a   : > { %v598_v52 = vmul.f32 %v1263_v50, %v590_v51 }
 0x27b   : > { %v1583_v54 = vpop.eup %1582 }
 0x27c   : > { %v591_v55 = vmul.f32 %v1583_v54, %v2032_v25  ;;  %v606_v56 = vadd.f32 %v1264_v53, %v598_v52  ;;  %v1300_v52 = vld [vmem:[%s2159_s8] ss:$0 sm:$0xff] }
 0x27e   : > { %v599_v57 = vmul.f32 %v1263_v50, %v591_v55  ;;  %1584 = vtanh.f32 %v606_v56 }
 0x280   : > { %v607_v58 = vadd.f32 %v1264_v53, %v599_v57 }
 0x282   : > { %1586 = vtanh.f32 %v607_v58 }
 0x28b   : > { %v2060_v59 = vpop.eup %1584 }
 0x28f   : > { %v2062_v60 = vpop.eup %1586 }
 0x290   : > { %v610_v63 = vpack.c.bf16 %v2062_v60, %v2060_v59 }
 0x292   : > { %1392 = vmatmul.mubr.bf16.vlgmr.msra.gmra.mxu1 %v610_v63  ;;  %1412 = vmatmul.mubr.bf16.vlgmr.msra.gmra.mxu0 %v610_v63 }
 0x293   : > { %1416 = vmatpush3.bf16.msra.mxu1 %v1564_v61  ;;  %1436 = vmatpush3.bf16.msra.mxu0 %v1565_v62 }
 0x294   : > { %1417 = vmatprep.subr.bf16.mxu1 %v1788_v0  ;;  %1437 = vmatprep.subr.bf16.mxu0 %v1788_v0 }
 0x295   : > { %1431 = vmatprep.mubr.msk.bf16.mxu1 %vm1789_vm0, %v1788_v0  ;;  %1451 = vmatprep.mubr.msk.bf16.mxu0 %vm1789_vm0, %v1788_v0 }
 0x297   : > { %1418 = vmatpush3.bf16.msra.mxu1 %v1566_v1  ;;  %1438 = vmatpush3.bf16.msra.mxu0 %v1567_v2 }
 0x298   : > { %1419 = vmatprep.subr.bf16.mxu1 %v1788_v0  ;;  %1439 = vmatprep.subr.bf16.mxu0 %v1788_v0 }
 0x29b   : > { %1420 = vmatpush3.bf16.msra.mxu1 %v1568_v3  ;;  %1440 = vmatpush3.bf16.msra.mxu0 %v1569_v4 }
 0x29c   : > { %1421 = vmatprep.subr.bf16.mxu1 %v1788_v0  ;;  %1441 = vmatprep.subr.bf16.mxu0 %v1788_v0 }
 0x29f   : > { %1422 = vmatpush3.bf16.msra.mxu1 %v1570_v5  ;;  %1442 = vmatpush3.bf16.msra.mxu0 %v1571_v6 }
 0x2a0   : > { %1423 = vmatprep.subr.bf16.mxu1 %v1788_v0  ;;  %1443 = vmatprep.subr.bf16.mxu0 %v1788_v0 }
 0x2a3   : > { %1424 = vmatpush3.bf16.msra.mxu1 %v1572_v7  ;;  %1444 = vmatpush3.bf16.msra.mxu0 %v1573_v8 }
 0x2a4   : > { %1425 = vmatprep.subr.bf16.mxu1 %v1788_v0  ;;  %1445 = vmatprep.subr.bf16.mxu0 %v1788_v0 }
 0x2a7   : > { %1426 = vmatpush3.bf16.msra.mxu1 %v1574_v9  ;;  %1446 = vmatpush3.bf16.msra.mxu0 %v1575_v10 }
 0x2a8   : > { %1427 = vmatprep.subr.bf16.mxu1 %v1788_v0  ;;  %1447 = vmatprep.subr.bf16.mxu0 %v1788_v0 }
 0x2ab   : > { %1428 = vmatpush3.bf16.msra.mxu1 %v1576_v11  ;;  %1448 = vmatpush3.bf16.msra.mxu0 %v1577_v12 }
 0x2ac   : > { %1429 = vmatprep.subr.bf16.mxu1 %v1788_v0  ;;  %1449 = vmatprep.subr.bf16.mxu0 %v1788_v0 }
 0x2af   : > { %1430 = vmatpush3.bf16.msra.mxu1 %v1578_v13  ;;  %1450 = vmatpush3.bf16.msra.mxu0 %v1579_v14 }
 0x352   : > { %v716_v17 = vpop.f32.mrf.mxu1  ;;  %v857_v18 = vpop.f32.mrf.mxu0 }
 0x353   : > { %v717_v19 = vadd.f32 %v1265_v15, %v716_v17  ;;  %v858_v20 = vadd.f32 %v1275_v16, %v857_v18  ;;  %v1301_v17 = vld [vmem:[%s2160_s9] ss:$0 sm:$0xff] }
 0x354   : > { %v1393_v21 = vpop.f32.mrf.mxu1  ;;  %v1413_v22 = vpop.f32.mrf.mxu0 }
 0x355   : > { %v725_v23 = vmul.f32 0.70710677, %v717_v19  ;;  %v866_v0 = vmul.f32 0.70710677, %v858_v20  ;;  %v723_v38 = vmul.f32 0.5, %v717_v19  ;;  %v864_v41 = vmul.f32 0.5, %v858_v20 }
 0x356   : > { %v719_v24 = vpop.f32.mrf.mxu1  ;;  %v860_v25 = vpop.f32.mrf.mxu0  ;;  %v1302_v19 = vld [vmem:[%s2161_s10] ss:$0 sm:$0xff] }
 0x357   : > { %1588 = verf.f32 %v725_v23  ;;  %v720_v26 = vadd.f32 %v1265_v15, %v719_v24  ;;  %v861_v27 = vadd.f32 %v1275_v16, %v860_v25 }
 0x358   : > { %1590 = verf.f32 %v866_v0  ;;  %v1394_v28 = vpop.f32.mrf.mxu1  ;;  %v1414_v29 = vpop.f32.mrf.mxu0 }
 0x359   : > { %v726_v30 = vmul.f32 0.70710677, %v720_v26  ;;  %v867_v31 = vmul.f32 0.70710677, %v861_v27  ;;  %v724_v39 = vmul.f32 0.5, %v720_v26  ;;  %v865_v42 = vmul.f32 0.5, %v861_v27 }
 0x35b   : > { %1592 = verf.f32 %v726_v30 }
 0x35c   : > { %1594 = verf.f32 %v867_v31 }
 0x364   : > { %v1589_v32 = vpop.eup %1588 }
 0x365   : > { %v1591_v33 = vpop.eup %1590  ;;  %v729_v34 = vadd.f32 1.0, %v1589_v32 }
 0x366   : > { %v870_v36 = vadd.f32 1.0, %v1591_v33 }
 0x367   : > { %v731_v44 = vmul.f32 %v729_v34, %v723_v38 }
 0x368   : > { %v1593_v35 = vpop.eup %1592  ;;  %v872_v46 = vmul.f32 %v870_v36, %v864_v41 }
 0x369   : > { %v1595_v37 = vpop.eup %1594  ;;  %v730_v40 = vadd.f32 1.0, %v1593_v35 }
 0x36a   : > { %v871_v43 = vadd.f32 1.0, %v1595_v37 }
 0x36b   : > { %v732_v45 = vmul.f32 %v730_v40, %v724_v39 }
 0x36c   : > { %v873_v47 = vmul.f32 %v871_v43, %v865_v42 }
 0x36d   : > { %v733_v48 = vpack.c.bf16 %v732_v45, %v731_v44 }
 0x36e   : > { %v874_v49 = vpack.c.bf16 %v873_v47, %v872_v46 }
 0x36f   : > { %1452 = vmatmul.mubr.bf16.vlgmr.msra.gmra.mxu0 %v733_v48 }
 0x370   : > { %1432 = vmatmul.mubr.bf16.vlgmr.msra.gmra.mxu1 %v874_v49 }
 0x42f   : > { %v1063_v50 = vpop.f32.mrf.mxu0 }
 0x430   : > { %v974_v51 = vpop.f32.mrf.mxu1 }
 0x431   : > { %v1064_v53 = vadd.f32 %v1063_v50, %v974_v51  ;;  %v1453_v54 = vpop.f32.mrf.mxu0 }
 0x432   : > { %v1433_v55 = vpop.f32.mrf.mxu1 }
 0x433   : > { %v1077_v56 = vadd.f32 %v1300_v52, %v1064_v53  ;;  %v1066_v57 = vpop.f32.mrf.mxu0 }
 0x434   : > { %v977_v58 = vpop.f32.mrf.mxu1 }
 0x435   : > { %v1067_v61 = vadd.f32 %v1066_v57, %v977_v58  ;;  %v1454_v62 = vpop.f32.mrf.mxu0  ;;  %v1079_v63 = vadd.f32 %v2060_v59, %v1077_v56 }
 0x436   : > { %v1434_v1 = vpop.f32.mrf.mxu1 }
 0x437   : > { %v1078_v2 = vadd.f32 %v1300_v52, %v1067_v61  ;;  %1083 = vadd.xlane.f32.xlu0 %v1079_v63 }
 0x439   : > { %v1080_v3 = vadd.f32 %v2062_v60, %v1078_v2 }
 0x43b   : > { %1085 = vadd.xlane.f32.xlu1 %v1080_v3 }
 0x4c0   : > { %v1084_v4 = vpop.xlane.xlu0 %1083 }
 0x4c1   : > { %v1087_v5 = vmul.f32 0.0078125, %v1084_v4 }
 0x4c3   : > { %v1089_v6 = vsub.f32 %v1079_v63, %v1087_v5 }
 0x4c4   : > { %v1086_v7 = vpop.xlane.xlu1 %1085 }
 0x4c5   : > { %v1088_v8 = vmul.f32 0.0078125, %v1086_v7  ;;  %v1091_v9 = vmul.f32 %v1089_v6, %v1089_v6 }
 0x4c7   : > { %v1090_v10 = vsub.f32 %v1080_v3, %v1088_v8  ;;  %1093 = vadd.xlane.f32.xlu0 %v1091_v9 }
 0x4c9   : > { %v1092_v11 = vmul.f32 %v1090_v10, %v1090_v10 }
 0x4cb   : > { %1095 = vadd.xlane.f32.xlu1 %v1092_v11 }
 0x550   : > { %v1094_v12 = vpop.xlane.xlu0 %1093 }
 0x551   : > { %v1097_v13 = vmul.f32 0.0078125, %v1094_v12 }
 0x553   : > { %v1099_v59 = vadd.f32 1e-05, %v1097_v13 }
 0x554   : > { %v1096_v14 = vpop.xlane.xlu1 %1095 }
 0x555   : > { %1596 = vrsqrt.f32 %v1099_v59  ;;  %v1098_v15 = vmul.f32 0.0078125, %v1096_v14 }
 0x557   : > { %v1100_v60 = vadd.f32 1e-05, %v1098_v15 }
 0x559   : > { %1598 = vrsqrt.f32 %v1100_v60 }
 0x562   : > { %v1597_v16 = vpop.eup %1596 }
 0x563   : > { %v1103_v18 = vmul.f32 %v1597_v16, %v1089_v6 }
 0x565   : > { %v1111_v20 = vmul.f32 %v1301_v17, %v1103_v18 }
 0x566   : > { %v1599_v21 = vpop.eup %1598 }
 0x567   : > { %v1119_v22 = vadd.f32 %v1302_v19, %v1111_v20  ;;  %v1104_v23 = vmul.f32 %v1599_v21, %v1090_v10 }
 0x569   : > { %v1112_v0 = vmul.f32 %v1301_v17, %v1104_v23  ;;  %1121 = vst [vmem:[%s448_s26] sm:$0xff] %v1119_v22 }
 0x56b   : > { %v1120_v24 = vadd.f32 %v1302_v19, %v1112_v0 }
 0x56d   : > { %1122 = vst [vmem:[%s448_s26 + $0x8] sm:$0xff] %v1120_v24 }
 0x56e   : > { %1719 = shalt.err (!%p1716_p9)
}
 0x56f   : > { %s1720_s16 = scalar_lea.hbm %s2107_s22, 256  ;;  %s1724_s23 = scalar_lea.hbm %s2162_s11, 768 }
 0x570   : > { %p1721_p1 = scmp.ne.s32.totalorder %s2107_s22, %s1720_s16  ;;  %p1725_p10 = scmp.lt.s32.totalorder %s2107_s22, %s2162_s11 }
 0x571   : > { %p1726_p12 = scmp.lt.s32.totalorder %s1724_s23, %s1720_s16 }
 0x572   : > { %p1722_p8 = pnand %p1721_p1, %p2189_p6 }
 0x573   : > { %p1727_p2 = por %p1726_p12, %p1725_p10 }
 0x574   : > { %p1723_p5 = pneg %p1722_p8 }
 0x576   : > { %p1728_p4 = pnand %p1727_p2, %p1723_p5 }
 0x578   : > { %1731 = shalt.err (!%p1728_p4)
}
 0x579   : > { %s1791_s29 = smov 128   ;;  %s1792_s27 = smov 8  }
 0x57a   : > { %1469 = dma.vmem_to_hbm [thread:$0]  (%p2189_p6), %s2109_s28, 256, %s2107_s22, %s1124_s7, %s1791_s29, %s1791_s29, %s1792_s27  }
 0x57b PF: > { %p1496_p11 = scmp.ge.s32.totalorder %s1778_s20, 2  ;;  %s1152_s15 = sand.u32 1, %s1766_s17  }
 0x57c   : > { %p2190_p13 = scmp.ne.s32.totalorder %s2173_s24, 0  ;;  %s1153_s21 = scalar_lea.sflag [#allocation4], %s1152_s15 }
 0x57e   : > { %p1486_p3 = pnand %p1496_p11, %p2190_p13 }
 0x580   : > { %p1487_p0 = pneg %p1486_p3 }
 0x582   : > { %1761 = dma.done.wait (%p1487_p0), %s1153_s21, 256  }
 0x583   : > { %1763 = vsyncadd (%p1487_p0), %s1153_s21, 4294967040  ;;  %s2191_s19 = sld [smem:[#allocation15_spill]]  ;;  %p26_p7 = scmp.ge.s32.totalorder %s1932_s30, 5  }
 0x584   : > { %s2192_s13 = sld [smem:[#allocation16_spill]]  ;;  %s2193_s17 = smov %s1770_s18 }
 0x585   : > { %s2196_s20 = smov %s1932_s30 }
 0x586   :  { %28 = sbr.rel (!%p26_p7) target bundleno = 11 (0xb), region = 124 }
 0x589   : > { %s2194_s18 = smov %s2191_s19 }
 0x58a   : > { %s2195_s19 = smov %s2192_s13 }
 0x58b   :  { %1158 = vsyncpa [#allocation3], 1 }
 0x58c   :  { %1160 = vsyncpa [#allocation3 + $0x1], 1 }
 0x58d   :  { %1161 = vsyncpa [#allocation6], 1 }
 0x58e   :  { %1162 = vsyncpa [#allocation9], 1 }
 0x58f   :  { %1163 = vsyncpa [#allocation4], 1 }
 0x590   :  { %1165 = vsyncpa [#allocation4 + $0x1], 1 }

</bundles_post_ra>
